<compile_context>
chip_gen: v7x
topology: tpu7x:2x2x1
jax: 0.10.0
libtpu: 0.0.40
codegen_flags: <defaults>
</compile_context>

<pallas_src>
import jax
import jax.numpy as jnp
from jax.experimental import pallas as pl
from jax.experimental.pallas import tpu as pltpu

_LANE = 128
_SUBLANE = 8

# Bytes budgeted for the big f32 pairwise intermediates (diff, e, e*v).  Chosen
# so that, together with double-buffered input/output tiles, the streamed W^T
# chunk and the num/den scratch, everything fits comfortably under the 32 MiB
# scoped-VMEM limit we request below (v5e default is only 16 MiB; v7x physical
# VMEM is 64 MiB, so 32 MiB is safe everywhere).
_INTERMEDIATE_BUDGET = 12 * 1024 * 1024
_VMEM_LIMIT = 32 * 1024 * 1024

# Batch-on-lanes layout is used only when it actually fills the 128-wide lane
# axis and the whole (T, T, 128) slab fits the budget (3*64*64*128*4 ~ 6.3 MiB).
_MIN_LANE_BATCH = 128
_MAX_LANE_T = 64


def _round_up(v, m):
    return (v + m - 1) // m * m


# ----------------------------------------------------------------------------
# Path A: batch rows on sublanes, features on lanes (general case; j-chunked
# accumulation for large T).
# ----------------------------------------------------------------------------
def _rbf_kernel_sublane(x_ref, xj_ref, wtj_ref, bj_ref, o_ref, num_ref, den_ref):
    # x_ref   : (TILE_B, T)   "query" rows x[b, :]        (resident across j)
    # xj_ref  : (TILE_B, TJ)  "key" j-chunk x[b, j0:j0+TJ] (second view of x)
    # wtj_ref : (T, TJ)       column chunk of W^T
    # bj_ref  : (1, TJ)       bias chunk
    # o_ref   : (TILE_B, T)   output block (same block across j -> resident)
    # num_ref : (TILE_B, T)   f32 scratch: sum_j e * v
    # den_ref : (TILE_B, T)   f32 scratch: sum_j e
    j = pl.program_id(1)

    @pl.when(j == 0)
    def _init():
        num_ref[...] = jnp.zeros_like(num_ref)
        den_ref[...] = jnp.zeros_like(den_ref)

    x = x_ref[...]                                           # (TILE_B, T)
    xj = xj_ref[...]                                         # (TILE_B, TJ)

    # Linear layer restricted to this chunk of output features (MXU, full K=T):
    #   v[:, j0:j0+TJ] = x @ W^T[:, j0:j0+TJ] + b[j0:j0+TJ]
    vj = jnp.dot(x, wtj_ref[...], preferred_element_type=jnp.float32) + bj_ref[...]

    # Pairwise scores for this chunk: s = -(x_i - x_j)^2 <= 0 with s == 0 on the
    # diagonal, so exp(s) is stable without a running-max pass.  The negation is
    # folded into the multiply (one VALU op per T*TJ element saved).
    diff = x[:, :, None] - xj[:, None, :]                    # (TILE_B, T, TJ)
    e = jnp.exp(diff * (-diff))                              # (TILE_B, T, TJ)

    vj_b = vj[:, None, :]                                    # hoisted broadcast
    num_ref[...] += jnp.sum(e * vj_b, axis=-1)               # (TILE_B, T)
    den_ref[...] += jnp.sum(e, axis=-1)                      # (TILE_B, T)

    @pl.when(j == pl.num_programs(1) - 1)
    def _finalize():
        # Softmax denominator fused into the output: one exact divide per row
        # (den >= 1 always, exact divide keeps the 1e-5 tolerance).
        o_ref[...] = (num_ref[...] / den_ref[...]).astype(o_ref.dtype)


def _choose_sublane_tiles(batch, t):
    """Pick (tile_b, n_b_blocks, tj) from the VMEM budget, not from MXU fill."""
    # j-chunk size: stream the pairwise j axis once a full (8, T, T) slab no
    # longer fits the intermediate budget.
    if 3 * t * max(t, _LANE) * 4 * _SUBLANE <= _INTERMEDIATE_BUDGET:
        tj = t
    elif t % 256 == 0 and 3 * t * 256 * 4 * _SUBLANE <= _INTERMEDIATE_BUDGET:
        tj = 256
    elif t % 128 == 0:
        tj = 128
    else:
        # TODO(synk): ragged T (> budget and not a multiple of 128) would need
        # masked j-chunks; fall back to whole rows with the minimum tile_b.
        tj = t

    per_row = 3 * t * max(tj, _LANE) * 4                     # diff, e, e*v (f32)
    tile_b = max(_SUBLANE, min(256, _INTERMEDIATE_BUDGET // per_row))
    tile_b = (tile_b // _SUBLANE) * _SUBLANE

    b8 = _round_up(batch, _SUBLANE)
    tile_b = min(tile_b, b8)
    n_blocks = pl.cdiv(b8, tile_b)
    # v7x has two TensorCores: keep >= 2 blocks on the parallel batch axis
    # whenever the batch is big enough to split into 8-row blocks.
    if n_blocks < 2 and batch >= 2 * _SUBLANE:
        n_blocks = 2
    tile_b = _round_up(pl.cdiv(b8, n_blocks), _SUBLANE)
    n_blocks = pl.cdiv(b8, tile_b)
    return tile_b, n_blocks, tj


def _forward_batch_on_sublanes(x, W, b):
    batch, t = x.shape
    tile_b, n_b_blocks, tj = _choose_sublane_tiles(batch, t)
    n_j_blocks = t // tj                                     # tj divides t by construction
    b_pad = n_b_blocks * tile_b
    if b_pad != batch:
        # Zero-padded rows produce harmless finite values (den >= 1) and are
        # sliced off below.
        x = jnp.pad(x, ((0, b_pad - batch), (0, 0)))

    wt = W.T                                                 # (T, T): v = x @ W^T + b
    b2 = b.reshape(1, t)

    out = pl.pallas_call(
        _rbf_kernel_sublane,
        out_shape=jax.ShapeDtypeStruct((b_pad, t), x.dtype),
        grid_spec=pltpu.PrefetchScalarGridSpec(
            num_scalar_prefetch=0,
            grid=(n_b_blocks, n_j_blocks),
            in_specs=[
                # x is passed twice on purpose: the full row tile ("queries",
                # resident across j) and the j-chunk view ("keys").  This lets
                # Pallas do the j-streaming without dynamic lane-axis slicing.
                pl.BlockSpec((tile_b, t), lambda i, j: (i, 0)),
                pl.BlockSpec((tile_b, tj), lambda i, j: (i, j)),
                pl.BlockSpec((t, tj), lambda i, j: (0, j)),   # W^T column chunk
                pl.BlockSpec((1, tj), lambda i, j: (0, j)),   # bias chunk
            ],
            out_specs=pl.BlockSpec((tile_b, t), lambda i, j: (i, 0)),
            scratch_shapes=[
                pltpu.VMEM((tile_b, t), jnp.float32),         # num accumulator
                pltpu.VMEM((tile_b, t), jnp.float32),         # den accumulator
            ],
        ),
        compiler_params=pltpu.CompilerParams(
            dimension_semantics=("parallel", "arbitrary"),
            vmem_limit_bytes=_VMEM_LIMIT,
        ),
    )(x, x, wt, b2)
    return out[:batch]


# ----------------------------------------------------------------------------
# Path B: small T, large batch -> batch rows on the LANE axis.
# ----------------------------------------------------------------------------
def _rbf_kernel_lane(xt_ref, w_ref, b_ref, o_ref):
    # xt_ref : (T, TILE_BL)  x^T block; batch on lanes (lane-dense at T < 128)
    # w_ref  : (T, T)        Linear weight W, so v^T = W @ x^T + b
    # b_ref  : (T, 1)
    # o_ref  : (T, TILE_BL)  lane-dense output block of y^T
    xt = xt_ref[...]                                         # (T, TILE_BL)
    vt = jnp.dot(w_ref[...], xt, preferred_element_type=jnp.float32) + b_ref[...]

    # diff[j, i, b] = x[b, j] - x[b, i]; squared -> symmetric, so e[j, i, b] is
    # the (i, j) softmax score.  j is the LEADING axis: the reductions below are
    # plain VALU adds across vreg rows, not cross-lane XLU reduces, and every
    # elementwise op / exp runs at full 128-lane occupancy.
    diff = xt[:, None, :] - xt[None, :, :]                   # (T_j, T_i, TILE_BL)
    e = jnp.exp(diff * (-diff))                              # stable: s <= 0, diag == 0

    vt_b = vt[:, None, :]                                    # hoisted broadcast over i
    num = jnp.sum(e * vt_b, axis=0)                          # (T_i, TILE_BL)
    den = jnp.sum(e, axis=0)                                 # (T_i, TILE_BL)
    o_ref[...] = (num / den).astype(o_ref.dtype)             # exact divide, den >= 1


def _forward_batch_on_lanes(x, W, b):
    batch, t = x.shape
    tile_bl = _LANE          # 128 batch rows per block fills the lane axis on every chip
    b_pad = _round_up(batch, tile_bl)
    n_blocks = b_pad // tile_bl                              # >= 2 blocks once batch >= 256

    xt = x.T                                                 # (T, B)
    if b_pad != batch:
        xt = jnp.pad(xt, ((0, 0), (0, b_pad - batch)))       # zero cols -> finite, sliced off
    b2 = b.reshape(t, 1)

    out_t = pl.pallas_call(
        _rbf_kernel_lane,
        out_shape=jax.ShapeDtypeStruct((t, b_pad), x.dtype),
        grid_spec=pltpu.PrefetchScalarGridSpec(
            num_scalar_prefetch=0,
            grid=(n_blocks,),
            in_specs=[
                pl.BlockSpec((t, tile_bl), lambda i: (0, i)),  # x^T batch-lane tile
                pl.BlockSpec((t, t), lambda i: (0, 0)),        # W (resident)
                pl.BlockSpec((t, 1), lambda i: (0, 0)),        # bias (resident)
            ],
            out_specs=pl.BlockSpec((t, tile_bl), lambda i: (0, i)),
        ),
        compiler_params=pltpu.CompilerParams(
            dimension_semantics=("parallel",),
            vmem_limit_bytes=_VMEM_LIMIT,
        ),
    )(xt, W, b2)
    return out_t.T[:batch]


# ----------------------------------------------------------------------------
# Public entry point + reference.
# ----------------------------------------------------------------------------
def rbf_kernel_layer_forward(x, W, b):
    """x: (B, T) float32, W: (T, T) (PyTorch nn.Linear weight), b: (T,)."""
    batch, t = x.shape
    if batch >= _MIN_LANE_BATCH and t <= _MAX_LANE_T:
        return _forward_batch_on_lanes(x, W, b)
    return _forward_batch_on_sublanes(x, W, b)


def rbf_kernel_layer_ref(x, W, b):
    """Pure-JAX reference matching the PyTorch module exactly."""
    v = x @ W.T + b
    diff = x[:, :, None] - x[:, None, :]
    K = jax.nn.softmax(-(diff * diff), axis=-1)
    return jnp.einsum("bij,bj->bi", K, v)


if __name__ == "__main__":
    key = jax.random.PRNGKey(0)

    def make_case(case_key, batch, input_size):
        kx, kw, kb = jax.random.split(case_key, 3)
        x = jax.random.normal(kx, (batch, input_size), dtype=jnp.float32)
        # Deterministic synthetic params for nn.Linear(input_size, input_size, bias=True)
        W = jax.random.normal(kw, (input_size, input_size), dtype=jnp.float32) * (
            1.0 / jnp.sqrt(input_size))
        b = jax.random.normal(kb, (input_size,), dtype=jnp.float32) * 0.1
        return x, W, b

    cases = [
        ("small batch, T=32 (batch on sublanes, single j-chunk)", 4, 32),
        ("large batch, T=32 (batch on lanes, 2 blocks + padding)", 192, 32),
        ("small batch, T=384 (j-chunked accumulation, 3 chunks)", 8, 384),
    ]
    case_keys = jax.random.split(key, len(cases))
    for case_key, (name, batch, input_size) in zip(case_keys, cases):
        x, W, b = make_case(case_key, batch, input_size)
        y = jax.block_until_ready(rbf_kernel_layer_forward(x, W, b))
        y_ref = rbf_kernel_layer_ref(x, W, b)
        assert y.shape == (batch, input_size), f"{name}: bad shape {y.shape}"
        max_err = float(jnp.max(jnp.abs(y - y_ref)))
        assert jnp.allclose(y, y_ref, rtol=1e-5, atol=1e-5), (
            f"{name}: max abs err = {max_err}")

    print("KERNEL_OK")
</pallas_src>

<mosaic_0001>
module attributes {stable_mosaic.version = 11 : i64} {
  func.func @_rbf_kernel_sublane(%arg0: i32, %arg1: i32, %arg2: memref<8x32xf32, #tpu.memory_space<vmem>>, %arg3: memref<8x32xf32, #tpu.memory_space<vmem>>, %arg4: memref<32x32xf32, #tpu.memory_space<vmem>>, %arg5: memref<1x32xf32, #tpu.memory_space<vmem>>, %arg6: memref<8x32xf32, #tpu.memory_space<vmem>>, %arg7: memref<8x32xf32, #tpu.memory_space<vmem>>, %arg8: memref<8x32xf32, #tpu.memory_space<vmem>>) attributes {dimension_semantics = [#tpu.dimension_semantics<parallel>, #tpu.dimension_semantics<arbitrary>], iteration_bounds = array<i64: 1, 1>, scalar_prefetch = 0 : i64, scratch_operands = 2 : i64, tpu.core_type = #tpu.core_type<tc>, window_params = [{transform_indices = @transform_0, window_bounds = array<i64: 8, 32>}, {transform_indices = @transform_1, window_bounds = array<i64: 8, 32>}, {transform_indices = @transform_2, window_bounds = array<i64: 32, 32>}, {transform_indices = @transform_3, window_bounds = array<i64: 1, 32>}, {transform_indices = @transform_4, window_bounds = array<i64: 8, 32>}]} {
    %c0_i32 = arith.constant 0 : i32
    %0 = arith.cmpi eq, %arg1, %c0_i32 : i32
    %1 = arith.extui %0 : i1 to i32
    %c0_i32_0 = arith.constant 0 : i32
    %2 = arith.cmpi ne, %1, %c0_i32_0 : i32
    scf.if %2 {
      %cst_21 = arith.constant 0.000000e+00 : f32
      %33 = vector.broadcast %cst_21 : f32 to vector<8x32xf32>
      %c0_22 = arith.constant 0 : index
      %c0_23 = arith.constant 0 : index
      %34 = vector.load %arg7[%c0_22, %c0_23] : memref<8x32xf32, #tpu.memory_space<vmem>>, vector<8x32xf32>
      tpu.vector_store %arg7[%c0_22, %c0_23], %33 {strides = array<i32>} : memref<8x32xf32, #tpu.memory_space<vmem>>, vector<8x32xf32>,
      %cst_24 = arith.constant 0.000000e+00 : f32
      %35 = vector.broadcast %cst_24 : f32 to vector<8x32xf32>
      %c0_25 = arith.constant 0 : index
      %c0_26 = arith.constant 0 : index
      %36 = vector.load %arg8[%c0_25, %c0_26] : memref<8x32xf32, #tpu.memory_space<vmem>>, vector<8x32xf32>
      tpu.vector_store %arg8[%c0_25, %c0_26], %35 {strides = array<i32>} : memref<8x32xf32, #tpu.memory_space<vmem>>, vector<8x32xf32>,
    } else {
    }
    %c0 = arith.constant 0 : index
    %c0_1 = arith.constant 0 : index
    %3 = vector.load %arg2[%c0, %c0_1] : memref<8x32xf32, #tpu.memory_space<vmem>>, vector<8x32xf32>
    %c0_2 = arith.constant 0 : index
    %c0_3 = arith.constant 0 : index
    %4 = vector.load %arg3[%c0_2, %c0_3] : memref<8x32xf32, #tpu.memory_space<vmem>>, vector<8x32xf32>
    %c0_4 = arith.constant 0 : index
    %c0_5 = arith.constant 0 : index
    %5 = vector.load %arg4[%c0_4, %c0_5] : memref<32x32xf32, #tpu.memory_space<vmem>>, vector<32x32xf32>
    %cst = arith.constant dense<0.000000e+00> : vector<8x32xf32>
    %6 = tpu.matmul %3, %5, %cst {dimension_numbers = #tpu.dot_dimension_numbers<[1], [0], [0], [1], [0, 0, 1, 1], [], []>} : vector<8x32xf32>, vector<32x32xf32>, vector<8x32xf32> -> vector<8x32xf32>
    %c0_6 = arith.constant 0 : index
    %c0_7 = arith.constant 0 : index
    %7 = vector.load %arg5[%c0_6, %c0_7] : memref<1x32xf32, #tpu.memory_space<vmem>>, vector<1x32xf32>
    %8 = vector.broadcast %7 : vector<1x32xf32> to vector<8x32xf32>
    %9 = arith.addf %6, %8 : vector<8x32xf32>
    %10 = vector.shape_cast %3 : vector<8x32xf32> to vector<8x32x1xf32>
    %11 = vector.shape_cast %4 : vector<8x32xf32> to vector<8x1x32xf32>
    %12 = vector.broadcast %10 : vector<8x32x1xf32> to vector<8x32x32xf32>
    %13 = vector.broadcast %11 : vector<8x1x32xf32> to vector<8x32x32xf32>
    %14 = arith.subf %12, %13 : vector<8x32x32xf32>
    %cst_8 = arith.constant 0.000000e+00 : f32
    %15 = vector.broadcast %cst_8 : f32 to vector<8x32x32xf32>
    %16 = arith.subf %15, %14 : vector<8x32x32xf32>
    %17 = arith.mulf %14, %16 : vector<8x32x32xf32>
    %18 = math.exp %17 : vector<8x32x32xf32>
    %19 = vector.shape_cast %9 : vector<8x32xf32> to vector<8x1x32xf32>
    %c0_9 = arith.constant 0 : index
    %c0_10 = arith.constant 0 : index
    %20 = vector.load %arg7[%c0_9, %c0_10] : memref<8x32xf32, #tpu.memory_space<vmem>>, vector<8x32xf32>
    %21 = vector.broadcast %19 : vector<8x1x32xf32> to vector<8x32x32xf32>
    %22 = arith.mulf %18, %21 : vector<8x32x32xf32>
    %cst_11 = arith.constant dense<0.000000e+00> : vector<8x32xf32>
    %23 = vector.multi_reduction <add>, %22, %cst_11 [2] : vector<8x32x32xf32> to vector<8x32xf32>
    %24 = arith.addf %20, %23 : vector<8x32xf32>
    %c0_12 = arith.constant 0 : index
    %c0_13 = arith.constant 0 : index
    %25 = vector.load %arg7[%c0_12, %c0_13] : memref<8x32xf32, #tpu.memory_space<vmem>>, vector<8x32xf32>
    tpu.vector_store %arg7[%c0_12, %c0_13], %24 {strides = array<i32>} : memref<8x32xf32, #tpu.memory_space<vmem>>, vector<8x32xf32>,
    %c0_14 = arith.constant 0 : index
    %c0_15 = arith.constant 0 : index
    %26 = vector.load %arg8[%c0_14, %c0_15] : memref<8x32xf32, #tpu.memory_space<vmem>>, vector<8x32xf32>
    %cst_16 = arith.constant dense<0.000000e+00> : vector<8x32xf32>
    %27 = vector.multi_reduction <add>, %18, %cst_16 [2] : vector<8x32x32xf32> to vector<8x32xf32>
    %28 = arith.addf %26, %27 : vector<8x32xf32>
    %c0_17 = arith.constant 0 : index
    %c0_18 = arith.constant 0 : index
    %29 = vector.load %arg8[%c0_17, %c0_18] : memref<8x32xf32, #tpu.memory_space<vmem>>, vector<8x32xf32>
    tpu.vector_store %arg8[%c0_17, %c0_18], %28 {strides = array<i32>} : memref<8x32xf32, #tpu.memory_space<vmem>>, vector<8x32xf32>,
    %c0_i32_19 = arith.constant 0 : i32
    %30 = arith.cmpi eq, %arg1, %c0_i32_19 : i32
    %31 = arith.extui %30 : i1 to i32
    %c0_i32_20 = arith.constant 0 : i32
    %32 = arith.cmpi ne, %31, %c0_i32_20 : i32
    scf.if %32 {
      %c0_21 = arith.constant 0 : index
      %c0_22 = arith.constant 0 : index
      %33 = vector.load %arg7[%c0_21, %c0_22] : memref<8x32xf32, #tpu.memory_space<vmem>>, vector<8x32xf32>
      %c0_23 = arith.constant 0 : index
      %c0_24 = arith.constant 0 : index
      %34 = vector.load %arg8[%c0_23, %c0_24] : memref<8x32xf32, #tpu.memory_space<vmem>>, vector<8x32xf32>
      %35 = arith.divf %33, %34 : vector<8x32xf32>
      %c0_25 = arith.constant 0 : index
      %c0_26 = arith.constant 0 : index
      %36 = vector.load %arg6[%c0_25, %c0_26] : memref<8x32xf32, #tpu.memory_space<vmem>>, vector<8x32xf32>
      tpu.vector_store %arg6[%c0_25, %c0_26], %35 {strides = array<i32>} : memref<8x32xf32, #tpu.memory_space<vmem>>, vector<8x32xf32>,
    } else {
    }
    return
  }
  func.func @transform_0(%arg0: i32, %arg1: i32) -> (i32, i32) {
    %c0_i32 = arith.constant 0 : i32
    %c0_i32_0 = arith.constant 0 : i32
    return %arg0, %c0_i32 : i32, i32
  }
  func.func @transform_1(%arg0: i32, %arg1: i32) -> (i32, i32) {
    %c0_i32 = arith.constant 0 : i32
    return %arg0, %arg1 : i32, i32
  }
  func.func @transform_2(%arg0: i32, %arg1: i32) -> (i32, i32) {
    %c0_i32 = arith.constant 0 : i32
    %c0_i32_0 = arith.constant 0 : i32
    return %c0_i32, %arg1 : i32, i32
  }
  func.func @transform_3(%arg0: i32, %arg1: i32) -> (i32, i32) {
    %c0_i32 = arith.constant 0 : i32
    %c0_i32_0 = arith.constant 0 : i32
    return %c0_i32, %arg1 : i32, i32
  }
  func.func @transform_4(%arg0: i32, %arg1: i32) -> (i32, i32) {
    %c0_i32 = arith.constant 0 : i32
    %c0_i32_0 = arith.constant 0 : i32
    return %arg0, %c0_i32 : i32, i32
  }
}

</mosaic_0001>

<bundles_post_ra>
// kernel: tpu_custom_call.1
= control target key start
LH: loop header
LB: loop body
LE: loop exit
PB: predicated region body
PF: predicated region fallthrough
CT: control target
= control target key end

     0   :  { %9 = vsyncpa [#allocation5], 0  ;;  %s2026_s0 = inlined_call_operand.hbm [shape: f32[8,32], index: 0, kind: input, shape index: {}]   ;;  %s2027_s1 = inlined_call_operand.hbm [shape: f32[8,32], index: 1, kind: input, shape index: {}]   ;;  %s2028_s2 = inlined_call_operand.hbm [shape: f32[32,32], index: 2, kind: input, shape index: {}]   ;;  %s2029_s3 = inlined_call_operand.vmem [shape: f32[1,32], index: 3, kind: input, shape index: {}]   ;;  %s2030_s4 = inlined_call_operand.hbm [shape: f32[8,32], index: 4, kind: output, shape index: {}]  }
   0x1   :  { %10 = vsyncpa [#allocation8], 0 }
   0x2   :  { %11 = vsyncpa [#allocation6], 0  ;;  %s1489_s15 = smov [#allocation7]   ;;  %s1490_s17 = smov [#allocation4]  }
   0x3   :  { %s28_s16 = sshll.u32 %s1489_s15, 4  ;;  %s18_s18 = sshll.u32 %s1490_s17, 4  ;;  %s29_s16 = int_to_ptr.vmem [resolvable:$true] %s28_s16  ;;  %s19_s18 = int_to_ptr.vmem [resolvable:$true] %s18_s18 }
   0x4   :  { %s1395_s21 = scalar_lea.hbm %s2027_s1, 128 }
   0x5   :  { %p1396_p0 = scmp.ne.s32.totalorder %s2027_s1, %s1395_s21  ;;  %p1399_p1 = scmp.lt.u32.totalorder %s1395_s21, %s2027_s1 }
   0x7   :  { %p1401_p2 = pnand %p1399_p1, %p1396_p0 }
   0x9   :  { %1404 = shalt.err (!%p1401_p2)
}
   0xa   :  { %s1405_s26 = scalar_lea.vmem %s29_s16, 128  ;;  %p1410_p4 = scmp.lt.s32.totalorder %s29_s16, %s29_s16 }
   0xb   :  { %p1406_p3 = scmp.ne.s32.totalorder %s29_s16, %s1405_s26  ;;  %p1411_p5 = scmp.lt.s32.totalorder %s1405_s26, %s1405_s26 }
   0xd   :  { %p1412_p6 = por %p1411_p5, %p1410_p4 }
   0xf   :  { %p1413_p7 = pnand %p1412_p6, %p1406_p3 }
  0x11   :  { %1416 = shalt.err (!%p1413_p7)
}
  0x12   :  { %31 = dma.hbm_to_vmem [thread:$0]  %s2027_s1, 128, %s29_s16, [#allocation8]  }
  0x13   :  { %s1417_s5 = scalar_lea.hbm %s2026_s0, 128 }
  0x14   :  { %p1418_p8 = scmp.ne.s32.totalorder %s2026_s0, %s1417_s5  ;;  %p1421_p9 = scmp.lt.u32.totalorder %s1417_s5, %s2026_s0 }
  0x16   :  { %p1423_p10 = pnand %p1421_p9, %p1418_p8 }
  0x18   :  { %1426 = shalt.err (!%p1423_p10)
}
  0x19   :  { %s1427_s10 = scalar_lea.vmem %s19_s18, 128  ;;  %p1432_p12 = scmp.lt.s32.totalorder %s19_s18, %s19_s18 }
  0x1a   :  { %p1428_p11 = scmp.ne.s32.totalorder %s19_s18, %s1427_s10  ;;  %p1433_p13 = scmp.lt.s32.totalorder %s1427_s10, %s1427_s10 }
  0x1c   :  { %p1434_p0 = por %p1433_p13, %p1432_p12 }
  0x1e   :  { %p1435_p1 = pnand %p1434_p0, %p1428_p11 }
  0x20   :  { %1438 = shalt.err (!%p1435_p1)
}
  0x21   :  { %21 = dma.hbm_to_vmem [thread:$0]  %s2026_s0, 128, %s19_s18, [#allocation5]  }
  0x22   :  { %s1491_s12 = smov [#allocation9]   ;;  %s1439_s16 = scalar_lea.hbm %s2028_s2, 512 }
  0x23   :  { %s37_s13 = sshll.u32 %s1491_s12, 4  ;;  %p1440_p2 = scmp.ne.s32.totalorder %s2028_s2, %s1439_s16  ;;  %s38_s13 = int_to_ptr.vmem [resolvable:$true] %s37_s13 }
  0x24   :  { %p1443_p3 = scmp.lt.u32.totalorder %s1439_s16, %s2028_s2 }
  0x26   :  { %p1445_p4 = pnand %p1443_p3, %p1440_p2 }
  0x28   :  { %1448 = shalt.err (!%p1445_p4)
}
  0x29   :  { %s1449_s22 = scalar_lea.vmem %s38_s13, 512  ;;  %p1454_p6 = scmp.lt.s32.totalorder %s38_s13, %s38_s13 }
  0x2a   :  { %p1450_p5 = scmp.ne.s32.totalorder %s38_s13, %s1449_s22  ;;  %p1455_p7 = scmp.lt.s32.totalorder %s1449_s22, %s1449_s22 }
  0x2c   :  { %p1456_p8 = por %p1455_p7, %p1454_p6 }
  0x2e   :  { %p1457_p9 = pnand %p1456_p8, %p1450_p5 }
  0x30   :  { %1460 = shalt.err (!%p1457_p9)
}
  0x31   :  { %s1492_s0 = smov 128   ;;  %s1493_s18 = smov 8  }
  0x32   :  { %43 = dma.hbm_to_vmem [thread:$0]  %s2028_s2, 512, %s38_s13, [#allocation8], %s1492_s0, %s1492_s0, %s1493_s18  }
  0x33   :  { %1483 = dma.done.wait [#allocation5], 128  }
  0x34   :  { %1484 = vsyncadd [#allocation5], 4294967168 }
  0x35   :  { %1485 = dma.done.wait [#allocation8], 640  }
  0x36   :  { %1486 = vsyncadd [#allocation8], 4294966656  ;;  %v149_v0 = vlaneseq  ;;  %vm59_vm0 = vcmask 261120   ;;  %v1494_v1 = vmov 0.0|0.0   ;;  %v1495_v2 = vmov 0.0   ;;  %v64_v5 = vld [vmem:[#allocation9] sm:$0xff] }
  0x37   :  { %1312 = vmatprep.subr.bf16.mxu0 %v1494_v1  ;;  %60 = vst.msk [vmem:[#allocation2] sm:$0xff] %vm59_vm0, %v1495_v2  ;;  %61 = vst.msk [vmem:[#allocation3] sm:$0xff] %vm59_vm0, %v1495_v2  ;;  %vm1496_vm1 = vmmov 0   ;;  %v65_v6 = vld [vmem:[#allocation9 + $0x8] sm:$0xff]  ;;  %v62_v7 = vld [vmem:[#allocation4] sm:$0xff]  ;;  %vm813_vm2 = vcmask 130112  }
  0x38   :  { %v1563_v3 = vshrl.u32 %v149_v0, 7  ;;  %1309 = vmatprep.mubr.msk.f32.mxu0 %vm1496_vm1, %v1495_v2  ;;  %v1313_v8 = vpack.c.bf16 %v65_v6, %v64_v5  ;;  %v66_v10 = vld [vmem:[#allocation9 + $0x10] sm:$0xff]  ;;  %v67_v11 = vld [vmem:[#allocation9 + $0x18] sm:$0xff]  ;;  %v1497_v27 = vmov 1966171168   ;;  %vm820_vm3 = vcmask 195712  }
  0x39   :  { %v1316_v12 = vpack.c.bf16 %v67_v11, %v66_v10  ;;  %v304_v28 = vunpack.c.l.s4 %v1497_v27  ;;  %v63_v31 = vld [vmem:[#allocation7] sm:$0xff]  ;;  %vm827_vm4 = vcmask 261312   ;;  %vm962_vm5 = vcmask 1041409  }
  0x3a   :  { %v1566_v4 = vsub.s32 0, %v1563_v3  ;;  %1314 = vmatpush3.bf16.msra.mxu0 %v1313_v8  ;;  %v170_v13 = vsub.s32 1, %v1563_v3  ;;  %v189_v15 = vsub.s32 2, %v1563_v3  ;;  %v208_v17 = vsub.s32 3, %v1563_v3 }
  0x3b   :  { %1315 = vmatprep.subr.bf16.mxu0 %v1494_v1  ;;  %v227_v19 = vsub.s32 4, %v1563_v3  ;;  %v246_v21 = vsub.s32 5, %v1563_v3  ;;  %v265_v23 = vsub.s32 6, %v1563_v3  ;;  %v284_v25 = vsub.s32 7, %v1563_v3 }
  0x3c   :  { %v152_v9 = vrot.slane %v62_v7, %v1566_v4  ;;  %v171_v14 = vrot.slane %v62_v7, %v170_v13  ;;  %v190_v16 = vrot.slane %v62_v7, %v189_v15  ;;  %v209_v18 = vrot.slane %v62_v7, %v208_v17 }
  0x3d   :  { %v228_v20 = vrot.slane %v62_v7, %v227_v19  ;;  %v247_v22 = vrot.slane %v62_v7, %v246_v21  ;;  %v266_v24 = vrot.slane %v62_v7, %v265_v23  ;;  %v285_v26 = vrot.slane %v62_v7, %v284_v25 }
  0x3e   :  { %162 = vbcast.lane.b32.xlu1 %v152_v9, 272  ;;  %154 = vbcast.lane.b32.xlu0 %v152_v9, 256  ;;  %v305_v29 = vunpack.c.0.s8 %v304_v28  ;;  %v302_v60 = vcombine.high %v63_v31, %v63_v31  ;;  %vm964_vm6 = vcmask 1042434   ;;  %vm966_vm7 = vcmask 1043459  }
  0x3f   :  { %1317 = vmatpush3.bf16.msra.mxu0 %v1316_v12  ;;  %vm968_vm8 = vcmask 1044484   ;;  %vm970_vm9 = vcmask 1045509   ;;  %vm972_vm10 = vcmask 1046534   ;;  %vm974_vm11 = vcmask 1047559  }
  0x40   :  { %v1578_v30 = vsub.s32 %v305_v29, %v1563_v3 }
  0x42   :  { %166 = vbcast.lane.b32.xlu1 %v152_v9, 280  ;;  %158 = vbcast.lane.b32.xlu0 %v152_v9, 264  ;;  %v309_v32 = vrot.slane %v63_v31, %v1578_v30 }
  0x43   :  { %1310 = vmatmul.mubr.msk.f32.vlgmr.msra.gmra.mrb[0].mxu0 %vm59_vm0, %v62_v7 }
  0x44   :  { %v325_v33 = vrot.slane %v309_v32, %v1578_v30  ;;  %v317_v34 = vcombine.high %v309_v32, %v309_v32 }
  0x46   :  { %177 = vbcast.lane.b32.xlu1 %v171_v14, 264  ;;  %173 = vbcast.lane.b32.xlu0 %v171_v14, 256  ;;  %v354_v35 = vrot.slane %v325_v33, %v1566_v4  ;;  %v339_v39 = vrot.slane %v317_v34, %v1578_v30  ;;  %v347_v55 = vcombine.high %v325_v33, %v325_v33 }
  0x48   :  { %v358_v45 = vrot.slane %v339_v39, %v1566_v4  ;;  %v362_v7 = vrot.slane %v347_v55, %v1566_v4  ;;  %v349_v8 = vcombine.high %v339_v39, %v339_v39 }
  0x4a   :  { %185 = vbcast.lane.b32.xlu1 %v171_v14, 280  ;;  %181 = vbcast.lane.b32.xlu0 %v171_v14, 272  ;;  %v316_v14 = vrot.slane %v302_v60, %v1578_v30  ;;  %v1588_v21 = vrot.slane %v349_v8, %v1566_v4 }
  0x4e   :  { %196 = vbcast.lane.b32.xlu1 %v190_v16, 264  ;;  %192 = vbcast.lane.b32.xlu0 %v190_v16, 256 }
  0x52   :  { %211 = vbcast.lane.b32.xlu1 %v209_v18, 256  ;;  %200 = vbcast.lane.b32.xlu0 %v190_v16, 272 }
  0x56   :  { %204 = vbcast.lane.b32.xlu1 %v190_v16, 280  ;;  %215 = vbcast.lane.b32.xlu0 %v209_v18, 264 }
  0x5a   :  { %230 = vbcast.lane.b32.xlu1 %v228_v20, 256  ;;  %219 = vbcast.lane.b32.xlu0 %v209_v18, 272 }
  0x5e   :  { %223 = vbcast.lane.b32.xlu1 %v209_v18, 280  ;;  %234 = vbcast.lane.b32.xlu0 %v228_v20, 264 }
  0x62   :  { %249 = vbcast.lane.b32.xlu1 %v247_v22, 256  ;;  %238 = vbcast.lane.b32.xlu0 %v228_v20, 272 }
  0x66   :  { %242 = vbcast.lane.b32.xlu1 %v228_v20, 280  ;;  %253 = vbcast.lane.b32.xlu0 %v247_v22, 264 }
  0x6a   :  { %268 = vbcast.lane.b32.xlu1 %v266_v24, 256  ;;  %257 = vbcast.lane.b32.xlu0 %v247_v22, 272 }
  0x6e   :  { %261 = vbcast.lane.b32.xlu1 %v247_v22, 280  ;;  %272 = vbcast.lane.b32.xlu0 %v266_v24, 264 }
  0x72   :  { %287 = vbcast.lane.b32.xlu1 %v285_v26, 256  ;;  %276 = vbcast.lane.b32.xlu0 %v266_v24, 272 }
  0x76   :  { %280 = vbcast.lane.b32.xlu1 %v266_v24, 280  ;;  %291 = vbcast.lane.b32.xlu0 %v285_v26, 264 }
  0x7a   :  { %299 = vbcast.lane.b32.xlu1 %v285_v26, 280  ;;  %295 = vbcast.lane.b32.xlu0 %v285_v26, 272  ;;  %v1591_v26 = vrot.slane %v316_v14, %v1578_v30 }
  0xb0   :  { %v163_v36 = vpop.permute.xlu1 %162  ;;  %v155_v38 = vpop.permute.xlu0 %154 }
  0xb1   :  { %v393_v37 = vsub.f32 %v163_v36, %v354_v35  ;;  %v391_v40 = vsub.f32 %v155_v38, %v354_v35 }
  0xb3   :  { %v425_v41 = vsub.f32 0.0, %v393_v37  ;;  %v423_v42 = vsub.f32 0.0, %v391_v40 }
  0xb4   :  { %v167_v43 = vpop.permute.xlu1 %166  ;;  %v159_v44 = vpop.permute.xlu0 %158 }
  0xb5   :  { %v455_v46 = vmul.f32 %v423_v42, %v391_v40  ;;  %v392_v47 = vsub.f32 %v159_v44, %v354_v35  ;;  %v394_v48 = vsub.f32 %v167_v43, %v354_v35  ;;  %v457_v49 = vmul.f32 %v425_v41, %v393_v37 }
  0xb6   :  { %v1600_v41 = vrot.slane %v1591_v26, %v1566_v4 }
  0xb7   :  { %v487_v50 = vmul.f32 1.442695, %v455_v46  ;;  %v424_v51 = vsub.f32 0.0, %v392_v47  ;;  %v426_v58 = vsub.f32 0.0, %v394_v48  ;;  %v491_v61 = vmul.f32 1.442695, %v457_v49 }
  0xb8   :  { %v178_v52 = vpop.permute.xlu1 %177  ;;  %v174_v54 = vpop.permute.xlu0 %173  ;;  %v318_v46 = vcombine.high %v316_v14, %v316_v14 }
  0xb9   :  { %v396_v53 = vsub.f32 %v178_v52, %v358_v45  ;;  %1329 = vpow2.f32 %v487_v50  ;;  %v456_v56 = vmul.f32 %v424_v51, %v392_v47  ;;  %v395_v57 = vsub.f32 %v174_v54, %v358_v45 }
  0xba   :  { %v458_v11 = vmul.f32 %v426_v58, %v394_v48 }
  0xbb   :  { %v428_v59 = vsub.f32 0.0, %v396_v53  ;;  %v489_v62 = vmul.f32 1.442695, %v456_v56  ;;  %v427_v63 = vsub.f32 0.0, %v395_v57 }
  0xbc   :  { %v186_v1 = vpop.permute.xlu1 %185  ;;  %v182_v6 = vpop.permute.xlu0 %181  ;;  %v493_v24 = vmul.f32 1.442695, %v458_v11 }
  0xbd   :  { %v460_v2 = vmul.f32 %v428_v59, %v396_v53  ;;  %v398_v5 = vsub.f32 %v186_v1, %v358_v45  ;;  %1331 = vpow2.f32 %v489_v62  ;;  %v459_v9 = vmul.f32 %v427_v63, %v395_v57 }
  0xbe   :  { %v397_v10 = vsub.f32 %v182_v6, %v358_v45  ;;  %1333 = vpow2.f32 %v491_v61  ;;  %v1616_v62 = vrot.slane %v318_v46, %v1578_v30 }
  0xbf   :  { %v497_v12 = vmul.f32 1.442695, %v460_v2  ;;  %v430_v13 = vsub.f32 0.0, %v398_v5  ;;  %v495_v15 = vmul.f32 1.442695, %v459_v9 }
  0xc0   :  { %v429_v16 = vsub.f32 0.0, %v397_v10  ;;  %v197_v17 = vpop.permute.xlu1 %196  ;;  %v193_v20 = vpop.permute.xlu0 %192 }
  0xc1   :  { %1335 = vpow2.f32 %v497_v12  ;;  %v462_v18 = vmul.f32 %v430_v13, %v398_v5  ;;  %v400_v19 = vsub.f32 %v197_v17, %v362_v7  ;;  %v399_v23 = vsub.f32 %v193_v20, %v362_v7 }
  0xc2   :  { %1337 = vpow2.f32 %v495_v15  ;;  %v461_v22 = vmul.f32 %v429_v16, %v397_v10  ;;  %v1628_v15 = vrot.slane %v1616_v62, %v1566_v4 }
  0xc3   :  { %v432_v25 = vsub.f32 0.0, %v400_v19  ;;  %v1593_v27 = vpop.eup %1329  ;;  %v501_v28 = vmul.f32 1.442695, %v462_v18  ;;  %v431_v31 = vsub.f32 0.0, %v399_v23 }
  0xc4   :  { %v499_v29 = vmul.f32 1.442695, %v461_v22  ;;  %v212_v32 = vpop.permute.xlu1 %211  ;;  %v201_v35 = vpop.permute.xlu0 %200  ;;  %v980_v36 = vsel %vm59_vm0, %v1593_v27, 0.0 }
  0xc5   :  { %v464_v33 = vmul.f32 %v432_v25, %v400_v19  ;;  %v403_v34 = vsub.f32 %v212_v32, %v1588_v21  ;;  %v463_v37 = vmul.f32 %v431_v31, %v399_v23  ;;  %v401_v38 = vsub.f32 %v201_v35, %v362_v7  ;;  %981 = vadd.xlane.f32.xlu1 %v980_v36 }
  0xc6   :  { %1339 = vpow2.f32 %v499_v29  ;;  %v348_v35 = vcombine.high %v1591_v26, %v1591_v26 }
  0xc7   :  { %1341 = vpow2.f32 %v493_v24  ;;  %v505_v39 = vmul.f32 1.442695, %v464_v33  ;;  %v435_v40 = vsub.f32 0.0, %v403_v34  ;;  %v1602_v42 = vpop.eup %1331  ;;  %v503_v43 = vmul.f32 1.442695, %v463_v37 }
  0xc8   :  { %1343 = vpow2.f32 %v501_v28  ;;  %v433_v44 = vsub.f32 0.0, %v401_v38  ;;  %v205_v45 = vpop.permute.xlu1 %204  ;;  %v983_v48 = vsel %vm59_vm0, %v1602_v42, 0.0  ;;  %v216_v50 = vpop.permute.xlu0 %215 }
  0xc9   :  { %1345 = vpow2.f32 %v505_v39  ;;  %v467_v47 = vmul.f32 %v435_v40, %v403_v34  ;;  %v402_v49 = vsub.f32 %v205_v45, %v362_v7  ;;  %v1606_v51 = vpop.eup %1333  ;;  %984 = vadd.xlane.f32.xlu0 %v983_v48  ;;  %v404_v53 = vsub.f32 %v216_v50, %v1588_v21 }
  0xca   :  { %1347 = vpow2.f32 %v503_v43  ;;  %v465_v52 = vmul.f32 %v433_v44, %v401_v38  ;;  %v986_v10 = vsel %vm59_vm0, %v1606_v51, 0.0 }
  0xcb   :  { %v1609_v54 = vpop.eup %1335  ;;  %v511_v55 = vmul.f32 1.442695, %v467_v47  ;;  %v434_v56 = vsub.f32 0.0, %v402_v49  ;;  %v436_v59 = vsub.f32 0.0, %v404_v53 }
  0xcc   :  { %v1611_v57 = vpop.eup %1337  ;;  %v507_v58 = vmul.f32 1.442695, %v465_v52  ;;  %v995_v60 = vsel %vm59_vm0, %v1609_v54, 0.0  ;;  %v231_v61 = vpop.permute.xlu1 %230 }
  0xcd   :  { %1349 = vpow2.f32 %v511_v55  ;;  %v466_v63 = vmul.f32 %v434_v56, %v402_v49  ;;  %v992_v1 = vsel %vm59_vm0, %v1611_v57, 0.0  ;;  %v407_v2 = vsub.f32 %v231_v61, %v1600_v41  ;;  %v220_v5 = vpop.permute.xlu0 %219  ;;  %996 = vadd.xlane.f32.xlu0 %v995_v60 }
  0xce   :  { %1351 = vpow2.f32 %v507_v58  ;;  %v468_v6 = vmul.f32 %v436_v59, %v404_v53  ;;  %993 = vadd.xlane.f32.xlu1 %v992_v1  ;;  %v405_v7 = vsub.f32 %v220_v5, %v1588_v21  ;;  %v1660_v58 = vrot.slane %v348_v35, %v1566_v4 }
  0xcf   :  { %v509_v8 = vmul.f32 1.442695, %v466_v63  ;;  %v439_v9 = vsub.f32 0.0, %v407_v2 }
  0xd0   :  { %v1624_v11 = vpop.eup %1339  ;;  %v513_v12 = vmul.f32 1.442695, %v468_v6  ;;  %v437_v13 = vsub.f32 0.0, %v405_v7  ;;  %v224_v14 = vpop.permute.xlu1 %223 }
  0xd1   :  { %v1630_v16 = vpop.eup %1341  ;;  %1353 = vpow2.f32 %v509_v8  ;;  %v471_v17 = vmul.f32 %v439_v9, %v407_v2  ;;  %v998_v18 = vsel %vm59_vm0, %v1624_v11, 0.0  ;;  %v406_v19 = vsub.f32 %v224_v14, %v1588_v21  ;;  %v235_v20 = vpop.permute.xlu0 %234 }
  0xd2   :  { %v1635_v22 = vpop.eup %1343  ;;  %1355 = vpow2.f32 %v513_v12  ;;  %v469_v23 = vmul.f32 %v437_v13, %v405_v7  ;;  %987 = vadd.xlane.f32.xlu1 %v986_v10  ;;  %999 = vadd.xlane.f32.xlu0 %v998_v18  ;;  %v408_v24 = vsub.f32 %v235_v20, %v1600_v41  ;;  %v989_v47 = vsel %vm59_vm0, %v1630_v16, 0.0 }
  0xd3   :  { %v1638_v25 = vpop.eup %1345  ;;  %v519_v28 = vmul.f32 1.442695, %v471_v17  ;;  %v438_v29 = vsub.f32 0.0, %v406_v19  ;;  %v1001_v26 = vsel %vm59_vm0, %v1635_v22, 0.0  ;;  %v350_v13 = vcombine.high %v1616_v62, %v1616_v62 }
  0xd4   :  { %v1640_v31 = vpop.eup %1347  ;;  %v515_v32 = vmul.f32 1.442695, %v469_v23  ;;  %v440_v33 = vsub.f32 0.0, %v408_v24  ;;  %v1007_v21 = vsel %vm59_vm0, %v1638_v25, 0.0  ;;  %v250_v34 = vpop.permute.xlu1 %249 }
  0xd5   :  { %1357 = vpow2.f32 %v519_v28  ;;  %v470_v36 = vmul.f32 %v438_v29, %v406_v19  ;;  %v1004_v37 = vsel %vm59_vm0, %v1640_v31, 0.0  ;;  %v411_v38 = vsub.f32 %v250_v34, %v1628_v15  ;;  %v239_v39 = vpop.permute.xlu0 %238 }
  0xd6   :  { %1359 = vpow2.f32 %v515_v32  ;;  %v472_v40 = vmul.f32 %v440_v33, %v408_v24  ;;  %1008 = vadd.xlane.f32.xlu0 %v1007_v21  ;;  %1005 = vadd.xlane.f32.xlu1 %v1004_v37  ;;  %v409_v43 = vsub.f32 %v239_v39, %v1600_v41  ;;  %v382_v35 = vrot.slane %v350_v13, %v1566_v4 }
  0xd7   :  { %v1650_v44 = vpop.eup %1349  ;;  %v517_v45 = vmul.f32 1.442695, %v470_v36  ;;  %v443_v46 = vsub.f32 0.0, %v411_v38 }
  0xd8   :  { %v1656_v48 = vpop.eup %1351  ;;  %v521_v49 = vmul.f32 1.442695, %v472_v40  ;;  %v441_v50 = vsub.f32 0.0, %v409_v43  ;;  %v243_v52 = vpop.permute.xlu1 %242  ;;  %v1016_v2 = vsel %vm59_vm0, %v1650_v44, 0.0 }
  0xd9   :  { %1361 = vpow2.f32 %v517_v45  ;;  %v475_v53 = vmul.f32 %v443_v46, %v411_v38  ;;  %v410_v55 = vsub.f32 %v243_v52, %v1600_v41  ;;  %v254_v56 = vpop.permute.xlu0 %253  ;;  %v1010_v41 = vsel %vm59_vm0, %v1656_v48, 0.0 }
  0xda   :  { %1363 = vpow2.f32 %v521_v49  ;;  %v473_v59 = vmul.f32 %v441_v50, %v409_v43  ;;  %1002 = vadd.xlane.f32.xlu0 %v1001_v26  ;;  %990 = vadd.xlane.f32.xlu1 %v989_v47  ;;  %v412_v60 = vsub.f32 %v254_v56, %v1628_v15 }
  0xdb   :  { %v1663_v61 = vpop.eup %1353  ;;  %v527_v63 = vmul.f32 1.442695, %v475_v53  ;;  %v442_v1 = vsub.f32 0.0, %v410_v55 }
  0xdc   :  { %v1669_v5 = vpop.eup %1355  ;;  %v523_v6 = vmul.f32 1.442695, %v473_v59  ;;  %v444_v7 = vsub.f32 0.0, %v412_v60  ;;  %v269_v8 = vpop.permute.xlu1 %268  ;;  %v1013_v23 = vsel %vm59_vm0, %v1663_v61, 0.0 }
  0xdd   :  { %1365 = vpow2.f32 %v527_v63  ;;  %v474_v9 = vmul.f32 %v442_v1, %v410_v55  ;;  %v415_v10 = vsub.f32 %v269_v8, %v1660_v58  ;;  %v258_v12 = vpop.permute.xlu0 %257  ;;  %v1019_v24 = vsel %vm59_vm0, %v1669_v5, 0.0 }
  0xde   :  { %1367 = vpow2.f32 %v523_v6  ;;  %v476_v14 = vmul.f32 %v444_v7, %v412_v60  ;;  %1017 = vadd.xlane.f32.xlu0 %v1016_v2  ;;  %1011 = vadd.xlane.f32.xlu1 %v1010_v41  ;;  %v413_v17 = vsub.f32 %v258_v12, %v1628_v15 }
  0xdf   :  { %v1675_v18 = vpop.eup %1357  ;;  %v525_v19 = vmul.f32 1.442695, %v474_v9  ;;  %v447_v20 = vsub.f32 0.0, %v415_v10 }
  0xe0   :  { %v1681_v28 = vpop.eup %1359  ;;  %v529_v29 = vmul.f32 1.442695, %v476_v14  ;;  %v445_v62 = vsub.f32 0.0, %v413_v17  ;;  %v262_v32 = vpop.permute.xlu1 %261  ;;  %v1028_v43 = vsel %vm59_vm0, %v1675_v18, 0.0 }
  0xe1   :  { %1369 = vpow2.f32 %v525_v19  ;;  %v479_v33 = vmul.f32 %v447_v20, %v415_v10  ;;  %v414_v21 = vsub.f32 %v262_v32, %v1628_v15  ;;  %v273_v34 = vpop.permute.xlu0 %272  ;;  %v1022_v45 = vsel %vm59_vm0, %v1681_v28, 0.0 }
  0xe2   :  { %1371 = vpow2.f32 %v529_v29  ;;  %v477_v36 = vmul.f32 %v445_v62, %v413_v17  ;;  %1014 = vadd.xlane.f32.xlu0 %v1013_v23  ;;  %1020 = vadd.xlane.f32.xlu1 %v1019_v24  ;;  %v416_v37 = vsub.f32 %v273_v34, %v1660_v58 }
  0xe3   :  { %v1686_v38 = vpop.eup %1361  ;;  %v535_v39 = vmul.f32 1.442695, %v479_v33  ;;  %v446_v40 = vsub.f32 0.0, %v414_v21 }
  0xe4   :  { %v1692_v15 = vpop.eup %1363  ;;  %v531_v46 = vmul.f32 1.442695, %v477_v36  ;;  %v448_v26 = vsub.f32 0.0, %v416_v37  ;;  %v288_v47 = vpop.permute.xlu1 %287  ;;  %v1025_v63 = vsel %vm59_vm0, %v1686_v38, 0.0 }
  0xe5   :  { %1373 = vpow2.f32 %v535_v39  ;;  %v478_v49 = vmul.f32 %v446_v40, %v414_v21  ;;  %v419_v50 = vsub.f32 %v288_v47, %v382_v35  ;;  %v277_v52 = vpop.permute.xlu0 %276  ;;  %v1031_v1 = vsel %vm59_vm0, %v1692_v15, 0.0 }
  0xe6   :  { %1375 = vpow2.f32 %v531_v46  ;;  %v480_v53 = vmul.f32 %v448_v26, %v416_v37  ;;  %1029 = vadd.xlane.f32.xlu0 %v1028_v43  ;;  %1023 = vadd.xlane.f32.xlu1 %v1022_v45  ;;  %v417_v55 = vsub.f32 %v277_v52, %v1660_v58 }
  0xe7   :  { %v1695_v56 = vpop.eup %1365  ;;  %v533_v59 = vmul.f32 1.442695, %v478_v49  ;;  %v451_v60 = vsub.f32 0.0, %v419_v50 }
  0xe8   :  { %v1701_v2 = vpop.eup %1367  ;;  %v537_v41 = vmul.f32 1.442695, %v480_v53  ;;  %v449_v6 = vsub.f32 0.0, %v417_v55  ;;  %v281_v7 = vpop.permute.xlu1 %280  ;;  %v1040_v20 = vsel %vm59_vm0, %v1695_v56, 0.0 }
  0xe9   :  { %1377 = vpow2.f32 %v533_v59  ;;  %v483_v8 = vmul.f32 %v451_v60, %v419_v50  ;;  %v418_v9 = vsub.f32 %v281_v7, %v1660_v58  ;;  %v292_v10 = vpop.permute.xlu0 %291  ;;  %v1034_v23 = vsel %vm59_vm0, %v1701_v2, 0.0 }
  0xea   :  { %1379 = vpow2.f32 %v537_v41  ;;  %v481_v12 = vmul.f32 %v449_v6, %v417_v55  ;;  %1026 = vadd.xlane.f32.xlu0 %v1025_v63  ;;  %1032 = vadd.xlane.f32.xlu1 %v1031_v1  ;;  %v420_v13 = vsub.f32 %v292_v10, %v382_v35 }
  0xeb   :  { %v1704_v14 = vpop.eup %1369  ;;  %v543_v17 = vmul.f32 1.442695, %v483_v8  ;;  %v450_v19 = vsub.f32 0.0, %v418_v9 }
  0xec   :  { %v1710_v24 = vpop.eup %1371  ;;  %v539_v29 = vmul.f32 1.442695, %v481_v12  ;;  %v452_v58 = vsub.f32 0.0, %v420_v13  ;;  %v300_v62 = vpop.permute.xlu1 %299  ;;  %v1037_v43 = vsel %vm59_vm0, %v1704_v14, 0.0 }
  0xed   :  { %1381 = vpow2.f32 %v543_v17  ;;  %v482_v32 = vmul.f32 %v450_v19, %v418_v9  ;;  %v296_v33 = vpop.permute.xlu0 %295  ;;  %v422_v21 = vsub.f32 %v300_v62, %v382_v35  ;;  %v1043_v45 = vsel %vm59_vm0, %v1710_v24, 0.0 }
  0xee   :  { %1383 = vpow2.f32 %v539_v29  ;;  %v484_v34 = vmul.f32 %v452_v58, %v420_v13  ;;  %1041 = vadd.xlane.f32.xlu0 %v1040_v20  ;;  %1035 = vadd.xlane.f32.xlu1 %v1034_v23  ;;  %v421_v36 = vsub.f32 %v296_v33, %v382_v35  ;;  %v1294_v29 = vld [vmem:[%s2029_s3] ss:$0 sm:$0xff]  ;;  %s1498_s3 = smov [#allocation10]  }
  0xef   :  { %v1712_v37 = vpop.eup %1373  ;;  %v541_v39 = vmul.f32 1.442695, %v482_v32  ;;  %v454_v40 = vsub.f32 0.0, %v422_v21  ;;  %s1284_s26 = sshll.u32 %s1498_s3, 4  ;;  %s1285_s26 = int_to_ptr.vmem [resolvable:$true] %s1284_s26 }
  0xf0   :  { %v1718_v46 = vpop.eup %1375  ;;  %v545_v26 = vmul.f32 1.442695, %v484_v34  ;;  %v453_v47 = vsub.f32 0.0, %v421_v36  ;;  %v1052_v53 = vsel %vm59_vm0, %v1712_v37, 0.0  ;;  %s1461_s27 = scalar_lea.vmem %s1285_s26, 128  ;;  %p1466_p11 = scmp.lt.s32.totalorder %s1285_s26, %s1285_s26 }
  0xf1   :  { %1385 = vpow2.f32 %v541_v39  ;;  %v486_v49 = vmul.f32 %v454_v40, %v422_v21  ;;  %v1046_v55 = vsel %vm59_vm0, %v1718_v46, 0.0  ;;  %p1462_p10 = scmp.ne.s32.totalorder %s1285_s26, %s1461_s27  ;;  %p1467_p12 = scmp.lt.s32.totalorder %s1461_s27, %s1461_s27 }
  0xf2   :  { %1387 = vpow2.f32 %v545_v26  ;;  %v485_v50 = vmul.f32 %v453_v47, %v421_v36  ;;  %1038 = vadd.xlane.f32.xlu0 %v1037_v43  ;;  %1044 = vadd.xlane.f32.xlu1 %v1043_v45 }
  0xf3   :  { %v1720_v35 = vpop.eup %1377  ;;  %v549_v52 = vmul.f32 1.442695, %v486_v49  ;;  %p1468_p13 = por %p1467_p12, %p1466_p11 }
  0xf4   :  { %v1726_v59 = vpop.eup %1379  ;;  %v547_v60 = vmul.f32 1.442695, %v485_v50  ;;  %v1049_v1 = vsel %vm59_vm0, %v1720_v35, 0.0 }
  0xf5   :  { %1389 = vpow2.f32 %v549_v52  ;;  %v1055_v41 = vsel %vm59_vm0, %v1726_v59, 0.0  ;;  %p1469_p0 = pnand %p1468_p13, %p1462_p10 }
  0xf6   :  { %1391 = vpow2.f32 %v547_v60  ;;  %1053 = vadd.xlane.f32.xlu0 %v1052_v53  ;;  %1047 = vadd.xlane.f32.xlu1 %v1046_v55 }
  0xf7   :  { %v1728_v63 = vpop.eup %1381 }
  0xf8   :  { %v1734_v6 = vpop.eup %1383  ;;  %v1064_v8 = vsel %vm59_vm0, %v1728_v63, 0.0 }
  0xf9   :  { %v1058_v9 = vsel %vm59_vm0, %v1734_v6, 0.0 }
  0xfa   :  { %1050 = vadd.xlane.f32.xlu0 %v1049_v1  ;;  %1056 = vadd.xlane.f32.xlu1 %v1055_v41 }
  0xfb   :  { %v1736_v7 = vpop.eup %1385 }
  0xfc   :  { %v1742_v10 = vpop.eup %1387  ;;  %v1061_v13 = vsel %vm59_vm0, %v1736_v7, 0.0 }
  0xfd   :  { %v1067_v17 = vsel %vm59_vm0, %v1742_v10, 0.0 }
  0xfe   :  { %1065 = vadd.xlane.f32.xlu0 %v1064_v8  ;;  %1059 = vadd.xlane.f32.xlu1 %v1058_v9 }
  0xff   :  { %v1744_v12 = vpop.eup %1389 }
 0x100   :  { %v1750_v19 = vpop.eup %1391  ;;  %v1073_v23 = vsel %vm59_vm0, %v1744_v12, 0.0 }
 0x101   :  { %v1070_v20 = vsel %vm59_vm0, %v1750_v19, 0.0 }
 0x102   :  { %1062 = vadd.xlane.f32.xlu0 %v1061_v13  ;;  %1068 = vadd.xlane.f32.xlu1 %v1067_v17 }
 0x106   :  { %1071 = vadd.xlane.f32.xlu1 %v1070_v20  ;;  %1074 = vadd.xlane.f32.xlu0 %v1073_v23 }
 0x116   :  { %v145_v58 = vpop.f32.mrb[0].mxu0 }
 0x117   :  { %v146_v62 = vadd.f32 %v1294_v29, %v145_v58  ;;  %v1311_v32 = vpop.f32.mrb[1].mxu0 }
 0x119   :  { %v552_v33 = vcombine.high %v146_v62, %v146_v62  ;;  %v559_v21 = vrot.slane %v146_v62, %v1578_v30 }
 0x11b   :  { %v566_v34 = vrot.slane %v552_v33, %v1578_v30  ;;  %v567_v36 = vcombine.high %v559_v21, %v559_v21  ;;  %v575_v39 = vrot.slane %v559_v21, %v1578_v30 }
 0x11d   :  { %v582_v40 = vrot.slane %v566_v34, %v1578_v30  ;;  %v1764_v43 = vrot.slane %v567_v36, %v1578_v30  ;;  %v605_v45 = vrot.slane %v575_v39, %v1566_v4  ;;  %v568_v50 = vcombine.high %v566_v34, %v566_v34 }
 0x11e   :  { %v597_v52 = vcombine.high %v575_v39, %v575_v39 }
 0x11f   :  { %v609_v26 = vrot.slane %v1764_v43, %v1566_v4  ;;  %v643_v47 = vmul.f32 %v1602_v42, %v605_v45  ;;  %v642_v49 = vmul.f32 %v1593_v27, %v605_v45  ;;  %v621_v53 = vrot.slane %v582_v40, %v1566_v4 }
 0x120   :  { %v644_v1 = vmul.f32 %v1606_v51, %v605_v45  ;;  %v596_v8 = vrot.slane %v568_v50, %v1578_v30  ;;  %v598_v9 = vcombine.high %v582_v40, %v582_v40  ;;  %v613_v42 = vrot.slane %v597_v52, %v1566_v4 }
 0x121   :  { %v677_v55 = vsel %vm59_vm0, %v643_v47, 0.0  ;;  %v674_v60 = vsel %vm59_vm0, %v642_v49, 0.0  ;;  %v646_v41 = vmul.f32 %v1611_v57, %v609_v26  ;;  %v645_v27 = vmul.f32 %v1630_v16, %v605_v45 }
 0x122   :  { %678 = vadd.xlane.f32.xlu1 %v677_v55  ;;  %675 = vadd.xlane.f32.xlu0 %v674_v60  ;;  %v680_v13 = vsel %vm59_vm0, %v644_v1, 0.0  ;;  %v648_v20 = vmul.f32 %v1624_v11, %v609_v26  ;;  %v660_v23 = vmul.f32 %v1701_v2, %v621_v53  ;;  %v661_v51 = vmul.f32 %v1704_v14, %v621_v53 }
 0x123   :  { %v686_v17 = vsel %vm59_vm0, %v646_v41, 0.0  ;;  %v600_v57 = vcombine.high %v596_v8, %v596_v8  ;;  %v647_v30 = vmul.f32 %v1609_v54, %v609_v26  ;;  %v625_v29 = vrot.slane %v596_v8, %v1566_v4 }
 0x124   :  { %v683_v58 = vsel %vm59_vm0, %v645_v27, 0.0  ;;  %v692_v16 = vsel %vm59_vm0, %v648_v20, 0.0  ;;  %v650_v62 = vmul.f32 %v1640_v31, %v613_v42  ;;  %v629_v32 = vrot.slane %v598_v9, %v1566_v4 }
 0x125   :  { %v663_v11 = vmul.f32 %v1710_v24, %v625_v29  ;;  %v664_v2 = vmul.f32 %v1718_v46, %v625_v29  ;;  %v665_v21 = vmul.f32 %v1720_v35, %v625_v29  ;;  %v633_v34 = vrot.slane %v600_v57, %v1566_v4 }
 0x126   :  { %681 = vadd.xlane.f32.xlu0 %v680_v13  ;;  %687 = vadd.xlane.f32.xlu1 %v686_v17  ;;  %v667_v14 = vmul.f32 %v1726_v59, %v629_v32  ;;  %v668_v54 = vmul.f32 %v1734_v6, %v629_v32  ;;  %v666_v33 = vmul.f32 %v1712_v37, %v629_v32  ;;  %v689_v31 = vsel %vm59_vm0, %v647_v30, 0.0 }
 0x127   :  { %v698_v36 = vsel %vm59_vm0, %v650_v62, 0.0  ;;  %v649_v39 = vmul.f32 %v1635_v22, %v609_v26  ;;  %v652_v24 = vmul.f32 %v1656_v48, %v613_v42  ;;  %v671_v46 = vmul.f32 %v1742_v10, %v633_v34 }
 0x128   :  { %v669_v59 = vmul.f32 %v1736_v7, %v629_v32  ;;  %v672_v37 = vmul.f32 %v1750_v19, %v633_v34  ;;  %v1805_v35 = vmul.f32 %v1728_v63, %v633_v34  ;;  %v1808_v6 = vmul.f32 %v1744_v12, %v633_v34 }
 0x129   :  { %v599_v40 = vcombine.high %v1764_v43, %v1764_v43  ;;  %v695_v22 = vsel %vm59_vm0, %v649_v39, 0.0  ;;  %v704_v48 = vsel %vm59_vm0, %v652_v24, 0.0  ;;  %v651_v45 = vmul.f32 %v1638_v25, %v613_v42 }
 0x12a   :  { %684 = vadd.xlane.f32.xlu0 %v683_v58  ;;  %693 = vadd.xlane.f32.xlu1 %v692_v16  ;;  %v659_v10 = vmul.f32 %v1692_v15, %v621_v53  ;;  %v653_v12 = vmul.f32 %v1663_v61, %v613_v42  ;;  %v728_v26 = vsel %vm59_vm0, %v660_v23, 0.0  ;;  %v658_v15 = vmul.f32 %v1675_v18, %v621_v53 }
 0x12b   :  { %v701_v7 = vsel %vm59_vm0, %v651_v45, 0.0  ;;  %v617_v19 = vrot.slane %v599_v40, %v1566_v4  ;;  %v731_v50 = vsel %vm59_vm0, %v661_v51, 0.0  ;;  %v737_v18 = vsel %vm59_vm0, %v663_v11, 0.0 }
 0x12c   :  { %v725_v63 = vsel %vm59_vm0, %v659_v10, 0.0  ;;  %v707_v43 = vsel %vm59_vm0, %v653_v12, 0.0  ;;  %v722_v49 = vsel %vm59_vm0, %v658_v15, 0.0  ;;  %v740_v55 = vsel %vm59_vm0, %v664_v2, 0.0 }
 0x12d   :  { %v655_v25 = vmul.f32 %v1669_v5, %v617_v19  ;;  %v656_v61 = vmul.f32 %v1681_v28, %v617_v19  ;;  %v654_v52 = vmul.f32 %v1650_v44, %v617_v19  ;;  %v657_v53 = vmul.f32 %v1686_v38, %v617_v19 }
 0x12e   :  { %690 = vadd.xlane.f32.xlu0 %v689_v31  ;;  %699 = vadd.xlane.f32.xlu1 %v698_v36  ;;  %v662_v60 = vmul.f32 %v1695_v56, %v625_v29  ;;  %v749_v44 = vsel %vm59_vm0, %v667_v14, 0.0  ;;  %v752_v41 = vsel %vm59_vm0, %v668_v54, 0.0  ;;  %v746_v38 = vsel %vm59_vm0, %v666_v33, 0.0 }
 0x12f   :  { %v713_v47 = vsel %vm59_vm0, %v655_v25, 0.0  ;;  %v716_v4 = vsel %vm59_vm0, %v656_v61, 0.0  ;;  %v710_v5 = vsel %vm59_vm0, %v654_v52, 0.0  ;;  %v719_v28 = vsel %vm59_vm0, %v657_v53, 0.0 }
 0x130   :  { %v734_v1 = vsel %vm59_vm0, %v662_v60, 0.0  ;;  %v743_v42 = vsel %vm59_vm0, %v665_v21, 0.0  ;;  %v761_v56 = vsel %vm59_vm0, %v671_v46, 0.0  ;;  %v755_v17 = vsel %vm59_vm0, %v669_v59, 0.0 }
 0x131   :  { %v764_v20 = vsel %vm59_vm0, %v672_v37, 0.0  ;;  %v758_v57 = vsel %vm59_vm0, %v1805_v35, 0.0  ;;  %v767_v58 = vsel %vm59_vm0, %v1808_v6, 0.0  ;;  %v803_v21 = vand.u32 127, %v149_v0 }
 0x132   :  { %696 = vadd.xlane.f32.xlu0 %v695_v22  ;;  %705 = vadd.xlane.f32.xlu1 %v704_v48 }
 0x133   :  { %v808_v36 = vadd.s32 4294967288, %v803_v21  ;;  %v815_v46 = vadd.s32 4294967280, %v803_v21  ;;  %v1860_v59 = vsub.s32 %v803_v21, %v1563_v3  ;;  %v822_v35 = vadd.s32 4294967272, %v803_v21 }
 0x135   :  { %v1863_v37 = vsub.s32 %v808_v36, %v1563_v3  ;;  %v1868_v0 = vsub.s32 %v815_v46, %v1563_v3 }
 0x136   :  { %702 = vadd.xlane.f32.xlu0 %v701_v7  ;;  %726 = vadd.xlane.f32.xlu1 %v725_v63  ;;  %v1875_v7 = vsub.s32 %v822_v35, %v1563_v3 }
 0x13a   :  { %708 = vadd.xlane.f32.xlu0 %v707_v43  ;;  %729 = vadd.xlane.f32.xlu1 %v728_v26 }
 0x13e   :  { %714 = vadd.xlane.f32.xlu1 %v713_v47  ;;  %723 = vadd.xlane.f32.xlu0 %v722_v49 }
 0x142   :  { %717 = vadd.xlane.f32.xlu1 %v716_v4  ;;  %732 = vadd.xlane.f32.xlu0 %v731_v50 }
 0x146   :  { %711 = vadd.xlane.f32.xlu0 %v710_v5  ;;  %738 = vadd.xlane.f32.xlu1 %v737_v18 }
 0x14a   :  { %720 = vadd.xlane.f32.xlu0 %v719_v28  ;;  %741 = vadd.xlane.f32.xlu1 %v740_v55 }
 0x14e   :  { %750 = vadd.xlane.f32.xlu1 %v749_v44  ;;  %735 = vadd.xlane.f32.xlu0 %v734_v1 }
 0x152   :  { %753 = vadd.xlane.f32.xlu1 %v752_v41  ;;  %747 = vadd.xlane.f32.xlu0 %v746_v38  ;;  %v982_v8 = vpop.xlane.xlu1 %981 }
 0x153   :  { %v1111_v22 = vrot.slane %v982_v8, %v1860_v59 }
 0x156   :  { %v985_v9 = vpop.xlane.xlu0 %984  ;;  %744 = vadd.xlane.f32.xlu0 %v743_v42  ;;  %762 = vadd.xlane.f32.xlu1 %v761_v56 }
 0x157   :  { %v1115_v48 = vrot.slane %v985_v9, %v1863_v37 }
 0x159   :  { %v1116_v43 = vsel %vm813_vm2, %v1115_v48, %v1111_v22 }
 0x15a   :  { %v997_v13 = vpop.xlane.xlu0 %996  ;;  %756 = vadd.xlane.f32.xlu0 %v755_v17  ;;  %765 = vadd.xlane.f32.xlu1 %v764_v20 }
 0x15b   :  { %v994_v27 = vpop.xlane.xlu1 %993  ;;  %v1134_v10 = vrot.slane %v997_v13, %v1863_v37 }
 0x15c   :  { %v1130_v45 = vrot.slane %v994_v27, %v1860_v59 }
 0x15e   :  { %759 = vadd.xlane.f32.xlu0 %v758_v57  ;;  %v1135_v25 = vsel %vm813_vm2, %v1134_v10, %v1130_v45 }
 0x15f   :  { %v988_v23 = vpop.xlane.xlu1 %987  ;;  %v1000_v51 = vpop.xlane.xlu0 %999 }
 0x160   :  { %v1120_v19 = vrot.slane %v988_v23, %v1868_v0  ;;  %v1139_v26 = vrot.slane %v1000_v51, %v1868_v0 }
 0x162   :  { %768 = vadd.xlane.f32.xlu0 %v767_v58  ;;  %v1121_v52 = vsel %vm820_vm3, %v1120_v19, %v1116_v43  ;;  %v1140_v28 = vsel %vm820_vm3, %v1139_v26, %v1135_v25 }
 0x163   :  { %v1006_v30 = vpop.xlane.xlu1 %1005  ;;  %v1009_v29 = vpop.xlane.xlu0 %1008 }
 0x164   :  { %v1149_v15 = vrot.slane %v1006_v30, %v1860_v59  ;;  %v1153_v47 = vrot.slane %v1009_v29, %v1863_v37 }
 0x166   :  { %v1154_v1 = vsel %vm813_vm2, %v1153_v47, %v1149_v15  ;;  %v979_v15 = vld [vmem:[#allocation3] sm:$0xff] }
 0x167   :  { %v991_v16 = vpop.xlane.xlu1 %990  ;;  %v1003_v62 = vpop.xlane.xlu0 %1002 }
 0x168   :  { %v1125_v49 = vrot.slane %v991_v16, %v1875_v7  ;;  %v1144_v5 = vrot.slane %v1003_v62, %v1875_v7 }
 0x16a   :  { %v1126_v9 = vsel %vm827_vm4, %v1125_v49, %v1121_v52  ;;  %v1145_v17 = vsel %vm827_vm4, %v1144_v5, %v1140_v28 }
 0x16b   :  { %v1848_v32 = vpop.xlane.xlu1 %1011  ;;  %v1018_v11 = vpop.xlane.xlu0 %1017 }
 0x16c   :  { %v1168_v3 = vrot.slane %v1018_v11, %v1860_v59  ;;  %v1158_v55 = vrot.slane %v1848_v32, %v1868_v0  ;;  %v1260_v11 = vsel %vm962_vm5, %v1145_v17, %v1126_v9 }
 0x16e   :  { %v1159_v57 = vsel %vm820_vm3, %v1158_v55, %v1154_v1 }
 0x16f   :  { %v1021_v2 = vpop.xlane.xlu1 %1020  ;;  %v1850_v14 = vpop.xlane.xlu0 %1014 }
 0x170   :  { %v1172_v61 = vrot.slane %v1021_v2, %v1863_v37  ;;  %v1163_v20 = vrot.slane %v1850_v14, %v1875_v7 }
 0x172   :  { %v1173_v42 = vsel %vm813_vm2, %v1172_v61, %v1168_v3 }
 0x173   :  { %v1852_v54 = vpop.xlane.xlu1 %1023  ;;  %v1030_v33 = vpop.xlane.xlu0 %1029 }
 0x174   :  { %v1187_v18 = vrot.slane %v1030_v33, %v1860_v59  ;;  %v1177_v41 = vrot.slane %v1852_v54, %v1868_v0 }
 0x176   :  { %v1178_v16 = vsel %vm820_vm3, %v1177_v41, %v1173_v42 }
 0x177   :  { %v1033_v34 = vpop.xlane.xlu1 %1032  ;;  %v1855_v31 = vpop.xlane.xlu0 %1026 }
 0x178   :  { %v1191_v53 = vrot.slane %v1033_v34, %v1863_v37  ;;  %v1182_v30 = vrot.slane %v1855_v31, %v1875_v7  ;;  %v1164_v34 = vsel %vm827_vm4, %v1163_v20, %v1159_v57 }
 0x17a   :  { %v1192_v23 = vsel %vm813_vm2, %v1191_v53, %v1187_v18 }
 0x17b   :  { %v1857_v39 = vpop.xlane.xlu1 %1035  ;;  %v1042_v24 = vpop.xlane.xlu0 %1041 }
 0x17c   :  { %v1206_v60 = vrot.slane %v1042_v24, %v1860_v59  ;;  %v1196_v56 = vrot.slane %v1857_v39, %v1868_v0  ;;  %v1183_v24 = vsel %vm827_vm4, %v1182_v30, %v1178_v16 }
 0x17e   :  { %v1197_v2 = vsel %vm820_vm3, %v1196_v56, %v1192_v23 }
 0x17f   :  { %v1045_v6 = vpop.xlane.xlu1 %1044  ;;  %v1865_v40 = vpop.xlane.xlu0 %1038 }
 0x180   :  { %v1210_v44 = vrot.slane %v1045_v6, %v1863_v37  ;;  %v1201_v62 = vrot.slane %v1865_v40, %v1875_v7  ;;  %v1261_v6 = vsel %vm964_vm6, %v1164_v34, %v1260_v11 }
 0x181   :  { %v1262_v10 = vsel %vm966_vm7, %v1183_v24, %v1261_v6 }
 0x182   :  { %v1211_v29 = vsel %vm813_vm2, %v1210_v44, %v1206_v60  ;;  %v1202_v35 = vsel %vm827_vm4, %v1201_v62, %v1197_v2 }
 0x183   :  { %v1048_v63 = vpop.xlane.xlu1 %1047  ;;  %v1054_v12 = vpop.xlane.xlu0 %1053  ;;  %v1263_v43 = vsel %vm968_vm8, %v1202_v35, %v1262_v10 }
 0x184   :  { %v1225_v38 = vrot.slane %v1054_v12, %v1860_v59  ;;  %v1215_v51 = vrot.slane %v1048_v63, %v1868_v0 }
 0x186   :  { %v1216_v31 = vsel %vm820_vm3, %v1215_v51, %v1211_v29 }
 0x187   :  { %v1057_v4 = vpop.xlane.xlu1 %1056  ;;  %v1051_v50 = vpop.xlane.xlu0 %1050 }
 0x188   :  { %v1229_v8 = vrot.slane %v1057_v4, %v1863_v37  ;;  %v1220_v14 = vrot.slane %v1051_v50, %v1875_v7 }
 0x18a   :  { %v1230_v32 = vsel %vm813_vm2, %v1229_v8, %v1225_v38  ;;  %v1221_v40 = vsel %vm827_vm4, %v1220_v14, %v1216_v31 }
 0x18b   :  { %v1060_v27 = vpop.xlane.xlu1 %1059  ;;  %v1066_v13 = vpop.xlane.xlu0 %1065  ;;  %v1264_v26 = vsel %vm970_vm9, %v1221_v40, %v1263_v43 }
 0x18c   :  { %v1234_v58 = vrot.slane %v1060_v27, %v1868_v0  ;;  %v1244_v54 = vrot.slane %v1066_v13, %v1860_v59 }
 0x18e   :  { %v1235_v46 = vsel %vm820_vm3, %v1234_v58, %v1230_v32 }
 0x18f   :  { %v1069_v33 = vpop.xlane.xlu1 %1068  ;;  %v1063_v21 = vpop.xlane.xlu0 %1062 }
 0x190   :  { %v1248_v36 = vrot.slane %v1069_v33, %v1863_v37  ;;  %v1239_v39 = vrot.slane %v1063_v21, %v1875_v7 }
 0x192   :  { %v1249_v22 = vsel %vm813_vm2, %v1248_v36, %v1244_v54  ;;  %v1240_v63 = vsel %vm827_vm4, %v1239_v39, %v1235_v46 }
 0x193   :  { %v1072_v48 = vpop.xlane.xlu1 %1071  ;;  %v1075_v45 = vpop.xlane.xlu0 %1074  ;;  %v1265_v47 = vsel %vm972_vm10, %v1240_v63, %v1264_v26 }
 0x194   :  { %v1253_v12 = vrot.slane %v1072_v48, %v1868_v0  ;;  %v1258_v19 = vrot.slane %v1075_v45, %v1875_v7 }
 0x196   :  { %v1254_v25 = vsel %vm820_vm3, %v1253_v12, %v1249_v22 }
 0x197   :  { %v1259_v49 = vsel %vm827_vm4, %v1258_v19, %v1254_v25 }
 0x198   :  { %v1266_v3 = vsel %vm974_vm11, %v1259_v49, %v1265_v47 }
 0x199   :  { %v1268_v61 = vadd.f32 %v1266_v3, %v979_v15 }
 0x19b   :  { %1269 = vst.msk [vmem:[#allocation3] sm:$0xff] %vm59_vm0, %v1268_v61 }
 0x1af   :  { %v679_v4 = vpop.xlane.xlu1 %678  ;;  %v676_v50 = vpop.xlane.xlu0 %675 }
 0x1b0   :  { %v812_v29 = vrot.slane %v679_v4, %v1863_v37  ;;  %v807_v58 = vrot.slane %v676_v50, %v1860_v59 }
 0x1b2   :  { %v814_v34 = vsel %vm813_vm2, %v812_v29, %v807_v58 }
 0x1b3   :  { %v682_v52 = vpop.xlane.xlu0 %681  ;;  %v688_v5 = vpop.xlane.xlu1 %687 }
 0x1b4   :  { %v832_v16 = vrot.slane %v688_v5, %v1860_v59  ;;  %v819_v32 = vrot.slane %v682_v52, %v1868_v0 }
 0x1b6   :  { %v821_v24 = vsel %vm820_vm3, %v819_v32, %v814_v34 }
 0x1b7   :  { %v685_v18 = vpop.xlane.xlu0 %684  ;;  %v694_v53 = vpop.xlane.xlu1 %693 }
 0x1b8   :  { %v841_v33 = vrot.slane %v694_v53, %v1868_v0  ;;  %v826_v31 = vrot.slane %v685_v18, %v1875_v7 }
 0x1ba   :  { %v828_v43 = vsel %vm827_vm4, %v826_v31, %v821_v24 }
 0x1bb   :  { %v691_v28 = vpop.xlane.xlu0 %690  ;;  %v700_v55 = vpop.xlane.xlu1 %699 }
 0x1bc   :  { %v836_v30 = vrot.slane %v691_v28, %v1863_v37  ;;  %v851_v36 = vrot.slane %v700_v55, %v1860_v59 }
 0x1be   :  { %v837_v2 = vsel %vm813_vm2, %v836_v30, %v832_v16 }
 0x1bf   :  { %v697_v60 = vpop.xlane.xlu0 %696  ;;  %v706_v44 = vpop.xlane.xlu1 %705  ;;  %v842_v46 = vsel %vm820_vm3, %v841_v33, %v837_v2  ;;  %v601_v2 = vld [vmem:[#allocation2] sm:$0xff] }
 0x1c0   :  { %v846_v14 = vrot.slane %v697_v60, %v1875_v7  ;;  %v860_v45 = vrot.slane %v706_v44, %v1868_v0 }
 0x1c2   :  { %v847_v6 = vsel %vm827_vm4, %v846_v14, %v842_v46 }
 0x1c3   :  { %v703_v1 = vpop.xlane.xlu0 %702  ;;  %v727_v41 = vpop.xlane.xlu1 %726  ;;  %v963_v49 = vsel %vm962_vm5, %v847_v6, %v828_v43 }
 0x1c4   :  { %v855_v54 = vrot.slane %v703_v1, %v1863_v37  ;;  %v893_v26 = vrot.slane %v727_v41, %v1863_v37 }
 0x1c6   :  { %v856_v40 = vsel %vm813_vm2, %v855_v54, %v851_v36 }
 0x1c7   :  { %v709_v38 = vpop.xlane.xlu0 %708  ;;  %v1943_v8 = vpop.xlane.xlu1 %729  ;;  %v861_v3 = vsel %vm820_vm3, %v860_v45, %v856_v40 }
 0x1c8   :  { %v865_v22 = vrot.slane %v709_v38, %v1875_v7 }
 0x1ca   :  { %v866_v4 = vsel %vm827_vm4, %v865_v22, %v861_v3 }
 0x1cb   :  { %v715_v9 = vpop.xlane.xlu1 %714  ;;  %v724_v42 = vpop.xlane.xlu0 %723 }
 0x1cc   :  { %v874_v35 = vrot.slane %v715_v9, %v1863_v37  ;;  %v889_v48 = vrot.slane %v724_v42, %v1860_v59  ;;  %v965_v9 = vsel %vm964_vm6, %v866_v4, %v963_v49  ;;  %v898_v42 = vrot.slane %v1943_v8, %v1868_v0 }
 0x1ce   :  { %v894_v50 = vsel %vm813_vm2, %v893_v26, %v889_v48 }
 0x1cf   :  { %v718_v56 = vpop.xlane.xlu1 %717  ;;  %v1945_v27 = vpop.xlane.xlu0 %732 }
 0x1d0   :  { %v879_v25 = vrot.slane %v718_v56, %v1868_v0  ;;  %v903_v60 = vrot.slane %v1945_v27, %v1875_v7 }
 0x1d3   :  { %v712_v13 = vpop.xlane.xlu0 %711  ;;  %v739_v17 = vpop.xlane.xlu1 %738 }
 0x1d4   :  { %v870_v21 = vrot.slane %v712_v13, %v1860_v59  ;;  %v912_v61 = vrot.slane %v739_v17, %v1863_v37 }
 0x1d6   :  { %v875_v10 = vsel %vm813_vm2, %v874_v35, %v870_v21 }
 0x1d7   :  { %v721_v20 = vpop.xlane.xlu0 %720  ;;  %v742_v23 = vpop.xlane.xlu1 %741  ;;  %v880_v52 = vsel %vm820_vm3, %v879_v25, %v875_v10 }
 0x1d8   :  { %v884_v63 = vrot.slane %v721_v20, %v1875_v7  ;;  %v917_v44 = vrot.slane %v742_v23, %v1868_v0  ;;  %v899_v23 = vsel %vm820_vm3, %v898_v42, %v894_v50 }
 0x1d9   :  { %v904_v29 = vsel %vm827_vm4, %v903_v60, %v899_v23 }
 0x1da   :  { %v885_v18 = vsel %vm827_vm4, %v884_v63, %v880_v52 }
 0x1db   :  { %v751_v51 = vpop.xlane.xlu1 %750  ;;  %v736_v57 = vpop.xlane.xlu0 %735  ;;  %v967_v20 = vsel %vm966_vm7, %v885_v18, %v965_v9 }
 0x1dc   :  { %v908_v12 = vrot.slane %v736_v57, %v1860_v59  ;;  %v931_v5 = vrot.slane %v751_v51, %v1863_v37 }
 0x1de   :  { %v913_v53 = vsel %vm813_vm2, %v912_v61, %v908_v12 }
 0x1df   :  { %v748_v62 = vpop.xlane.xlu0 %747  ;;  %v754_v11 = vpop.xlane.xlu1 %753  ;;  %v918_v27 = vsel %vm820_vm3, %v917_v44, %v913_v53 }
 0x1e0   :  { %v927_v15 = vrot.slane %v748_v62, %v1860_v59  ;;  %v936_v28 = vrot.slane %v754_v11, %v1868_v0  ;;  %v1274_v62 = vld [vmem:[#allocation3] sm:$0xff] }
 0x1e1   :  { %1393 = vrcp.f32 %v1274_v62 }
 0x1e2   :  { %v932_v1 = vsel %vm813_vm2, %v931_v5, %v927_v15 }
 0x1e3   :  { %v745_v39 = vpop.xlane.xlu0 %744  ;;  %v763_v19 = vpop.xlane.xlu1 %762  ;;  %v937_v57 = vsel %vm820_vm3, %v936_v28, %v932_v1 }
 0x1e4   :  { %v922_v55 = vrot.slane %v745_v39, %v1875_v7  ;;  %v950_v56 = vrot.slane %v763_v19, %v1863_v37 }
 0x1e6   :  { %v923_v51 = vsel %vm827_vm4, %v922_v55, %v918_v27 }
 0x1e7   :  { %v757_v47 = vpop.xlane.xlu0 %756  ;;  %v766_v13 = vpop.xlane.xlu1 %765 }
 0x1e8   :  { %v941_v41 = vrot.slane %v757_v47, %v1875_v7  ;;  %v955_v37 = vrot.slane %v766_v13, %v1868_v0 }
 0x1ea   :  { %v942_v8 = vsel %vm827_vm4, %v941_v41, %v937_v57 }
 0x1eb   :  { %v760_v38 = vpop.xlane.xlu0 %759  ;;  %v1394_v0 = vpop.eup %1393 }
 0x1ec   :  { %v946_v17 = vrot.slane %v760_v38, %v1860_v59  ;;  %v969_v59 = vsel %vm968_vm8, %v904_v29, %v967_v20 }
 0x1ed   :  { %v971_v32 = vsel %vm970_vm9, %v923_v51, %v969_v59 }
 0x1ee   :  { %v951_v30 = vsel %vm813_vm2, %v950_v56, %v946_v17  ;;  %v973_v14 = vsel %vm972_vm10, %v942_v8, %v971_v32 }
 0x1ef   :  { %v769_v58 = vpop.xlane.xlu0 %768  ;;  %v956_v11 = vsel %vm820_vm3, %v955_v37, %v951_v30 }
 0x1f0   :  { %v960_v16 = vrot.slane %v769_v58, %v1875_v7 }
 0x1f2   :  { %v961_v54 = vsel %vm827_vm4, %v960_v16, %v956_v11 }
 0x1f3   :  { %v975_v33 = vsel %vm974_vm11, %v961_v54, %v973_v14 }
 0x1f4   :  { %v977_v21 = vadd.f32 %v975_v33, %v601_v2 }
 0x1f6   :  { %978 = vst.msk [vmem:[#allocation2] sm:$0xff] %vm59_vm0, %v977_v21 }
 0x1fd   :  { %v1273_v7 = vld [vmem:[#allocation2] sm:$0xff] }
 0x1fe   :  { %v1276_v34 = vmul.f32 %v1394_v0, %v1273_v7 }
 0x200   :  { %1277 = vst.msk [vmem:[#allocation10] sm:$0xff] %vm59_vm0, %v1276_v34 }
 0x201   :  { %1472 = shalt.err (!%p1469_p0)
}
 0x202   :  { %s1473_s30 = scalar_lea.hbm %s2030_s4, 128 }
 0x203   :  { %p1474_p1 = scmp.ne.s32.totalorder %s2030_s4, %s1473_s30  ;;  %p1477_p2 = scmp.lt.u32.totalorder %s1473_s30, %s2030_s4 }
 0x205   :  { %p1479_p3 = pnand %p1477_p2, %p1474_p1 }
 0x207   :  { %1482 = shalt.err (!%p1479_p3)
}
 0x208   :  { %1287 = dma.vmem_to_hbm [thread:$0]  %s1285_s26, 128, %s2030_s4, [#allocation6]  }
 0x209   :  { %1487 = dma.done.wait [#allocation6], 128  }
 0x20a   :  { %1488 = vsyncadd [#allocation6], 4294967168 }
 0x20b   :  { %1291 = vsyncpa [#allocation5], 1 }
 0x20c   :  { %1292 = vsyncpa [#allocation8], 1 }
 0x20d   :  { %1293 = vsyncpa [#allocation6], 1 }

</bundles_post_ra>
